<compile_context>
chip_gen: v7x
topology: tpu7x:2x2x1
jax: 0.10.0
libtpu: 0.0.40
codegen_flags: <defaults>
</compile_context>

<pallas_src>
import math
import functools

import jax
import jax.numpy as jnp
from jax.experimental import pallas as pl
from jax.experimental.pallas import tpu as pltpu


def _pma_kernel(q_ref, x_ref, wkv_ref, bkv_ref, wo_ref, bo_ref, msel_ref, o_ref,
                *, scale: float, use_bf16: bool):
    """One grid step processes a block of TB batch elements end-to-end.

    Shapes (Dp = lane-padded feature dim, H = num_heads):
      q_ref   : (Nq, Dp)       hoisted, batch-invariant Q projection (f32)
      x_ref   : (TB*Nk, Dp)    flattened batch block of X (f32 or bf16)
      wkv_ref : (Dp, 2*Dp)     fused [Wk | Wv]
      bkv_ref : (1, 2*Dp)
      wo_ref  : (Dp, Dp)
      bo_ref  : (1, Dp)
      msel_ref: (Dp, H)        msel[d, h] = 1.0 iff (unpadded) feature d is in head h
      o_ref   : (TB, Nq, Dp)
    """
    TB, Nq, Dp = o_ref.shape
    Nk = x_ref.shape[0] // TB
    H = msel_ref.shape[1]

    Q = q_ref[...]                                          # (Nq, Dp), f32

    # ---- fused K/V projection: one dense lane-aligned MXU matmul ------------
    KV = jnp.dot(x_ref[...], wkv_ref[...],
                 preferred_element_type=jnp.float32) + bkv_ref[...]  # (TB*Nk, 2Dp)
    K = KV[:, :Dp].reshape(TB, Nk, Dp)                      # 128-aligned split
    V = KV[:, Dp:].reshape(TB, Nk, Dp)

    # ---- attention (head_dim is tiny -> VPU/XLU path, no head relayout) -----
    # NOTE: for large head_dim / Nk the (TB, Nq, Nk, Dp) product gets big; a
    # head-major dot_general path would be preferable there.
    msel = msel_ref[...]                                    # (Dp, H), f32 0/1
    prod = Q[None, :, None, :] * K[:, None, :, :]           # (TB, Nq, Nk, Dp), VPU
    logits = jnp.dot(prod.reshape(TB * Nq * Nk, Dp), msel,
                     preferred_element_type=jnp.float32)    # per-head sums over ds
    logits = (logits * scale).reshape(TB, Nq, Nk, H)
    logits = logits - jnp.max(logits, axis=2, keepdims=True)    # softmax over Nk
    p = jnp.exp(logits)
    A = p * pl.reciprocal(jnp.sum(p, axis=2, keepdims=True), approx=False)
    # Broadcast per-head probabilities back over each head's feature lanes
    # (contraction over H, no transpose materialised), then PV on the VPU/XLU.
    a_exp = jax.lax.dot_general(A.reshape(TB * Nq * Nk, H), msel,
                                (((1,), (1,)), ((), ())),
                                preferred_element_type=jnp.float32)  # (TB*Nq*Nk, Dp)
    ctx = jnp.sum(a_exp.reshape(TB, Nq, Nk, Dp) * V[:, None, :, :], axis=2)
    O = Q[None, :, :] + ctx                                 # residual uses unscaled Q

    # ---- output MLP + residual: ONE dense matmul over flattened rows --------
    Of = O.reshape(TB * Nq, Dp)
    Of_mm = Of.astype(jnp.bfloat16) if use_bf16 else Of
    fcO = jnp.dot(Of_mm, wo_ref[...],
                  preferred_element_type=jnp.float32) + bo_ref[...]
    o_ref[...] = (O + jnp.maximum(fcO.reshape(TB, Nq, Dp), 0.0)).astype(o_ref.dtype)


def _pad_last(a, target):
    pad = target - a.shape[-1]
    if pad == 0:
        return a
    return jnp.pad(a, [(0, 0)] * (a.ndim - 1) + [(0, pad)])


def _pad_2d(a, rows, cols):
    return jnp.pad(a, ((0, rows - a.shape[0]), (0, cols - a.shape[1])))


def _pick_batch_block(B, Nk, Dp, *, target_bytes=2 << 20, min_blocks=2):
    """Largest divisor of B whose X tile respects the BlockSpec sublane rule,
    stays around `target_bytes`, and leaves >= min_blocks grid steps (so both
    v7x TensorCores get work and the X DMA can overlap compute)."""
    divisors = [d for d in range(1, B + 1) if B % d == 0]
    legal = [d for d in divisors if (d * Nk) % 8 == 0 or d == B]
    if not legal:
        return B
    fits = [d for d in legal if d * Nk * Dp * 4 <= target_bytes] or legal
    multi = [d for d in fits if B // d >= min_blocks] or fits
    return max(multi)


def pma_forward(X, S, Wq, bq, Wk, bk, Wv, bv, Wo, bo, *, num_heads,
                batch_block=None, use_bf16=False):
    """X: (B, Nk, D); S: (Nq, D); W*: (D, D) in (in, out) orientation; b*: (1, D)."""
    B, Nk, D = X.shape
    Nq = S.shape[0]
    assert D % num_heads == 0
    ds = D // num_heads
    scale = 1.0 / math.sqrt(D)          # PyTorch uses sqrt(Q.shape[-1]) == sqrt(dim_V)

    LANE = 128
    Dp = ((D + LANE - 1) // LANE) * LANE            # lane-padded feature dim

    # ---- wrapper-side prep (plain XLA, once per call) ------------------------
    # Hoist the batch-invariant Q projection out of the kernel.
    Q = _pad_last(S @ Wq + bq, Dp)                                          # (Nq, Dp)
    # Fuse + lane-pad the K/V projection; K/V split lands on a 128 boundary.
    Wkv = jnp.concatenate([_pad_2d(Wk, Dp, Dp), _pad_2d(Wv, Dp, Dp)], axis=1)  # (Dp, 2Dp)
    bkv = jnp.concatenate([_pad_last(bk, Dp), _pad_last(bv, Dp)], axis=1)      # (1, 2Dp)
    Wop = _pad_2d(Wo, Dp, Dp)
    bop = _pad_last(bo, Dp)
    Xf = _pad_last(X.reshape(B * Nk, D), Dp)                                # (B*Nk, Dp)
    # 0/1 head selector: msel[d, h] = 1 iff (unpadded) feature d belongs to head h.
    d_idx = jnp.arange(Dp)[:, None]
    msel = (((d_idx // ds) == jnp.arange(num_heads)[None, :]) &
            (d_idx < D)).astype(jnp.float32)                                # (Dp, H)

    if use_bf16:
        # Pre-cast the big MXU operands once (half the HBM->VMEM bytes, no
        # per-step casts).  Biases, Q, the selector and all accumulation stay
        # f32.  Keep use_bf16=False on v5e (no bf16 VPU/EUP datapath).
        Xf = Xf.astype(jnp.bfloat16)
        Wkv = Wkv.astype(jnp.bfloat16)
        Wop = Wop.astype(jnp.bfloat16)

    if batch_block is None:
        batch_block = _pick_batch_block(B, Nk, Dp)
    assert B % batch_block == 0
    assert (batch_block * Nk) % 8 == 0 or batch_block == B, (
        "X block sublane dim must be a multiple of 8 (or cover the full batch)")
    num_blocks = B // batch_block

    kernel = functools.partial(_pma_kernel, scale=scale, use_bf16=use_bf16)

    grid_spec = pltpu.PrefetchScalarGridSpec(
        num_scalar_prefetch=0,
        grid=(num_blocks,),
        in_specs=[
            pl.BlockSpec((Nq, Dp), lambda i: (0, 0)),                  # Q (hoisted)
            pl.BlockSpec((batch_block * Nk, Dp), lambda i: (i, 0)),    # X rows
            # Grid-constant weight blocks (resident across the grid).
            # NOTE(v7x, large D): single-buffer these (pipeline_mode=pl.Buffered(1))
            # / hold them in bf16 and tile the projection over a K axis once
            # Dp*2Dp*4B approaches the 64 MiB VMEM budget; here they are ~KiB.
            pl.BlockSpec((Dp, 2 * Dp), lambda i: (0, 0)),              # Wkv
            pl.BlockSpec((1, 2 * Dp), lambda i: (0, 0)),               # bkv
            pl.BlockSpec((Dp, Dp), lambda i: (0, 0)),                  # Wo
            pl.BlockSpec((1, Dp), lambda i: (0, 0)),                   # bo
            pl.BlockSpec((Dp, num_heads), lambda i: (0, 0)),           # head selector
        ],
        out_specs=pl.BlockSpec((batch_block, Nq, Dp), lambda i: (i, 0, 0)),
    )

    out = pl.pallas_call(
        kernel,
        out_shape=jax.ShapeDtypeStruct((B, Nq, Dp), jnp.float32),
        grid_spec=grid_spec,
        compiler_params=pltpu.CompilerParams(
            dimension_semantics=("parallel",),
            vmem_limit_bytes=32 * 1024 * 1024),
    )(Q, Xf, Wkv, bkv, Wop, bop, msel)

    return out[:, :, :D]    # strip lane padding (zero columns by construction)


def pma_reference(X, S, Wq, bq, Wk, bk, Wv, bv, Wo, bo, *, num_heads):
    """Pure-JAX reference mirroring the PyTorch forward (for verification)."""
    B, Nk, D = X.shape
    Nq = S.shape[0]
    ds = D // num_heads
    Q = jnp.broadcast_to((S @ Wq + bq)[None], (B, Nq, D))
    K = X @ Wk + bk
    V = X @ Wv + bv
    Qh = Q.reshape(B, Nq, num_heads, ds)
    Kh = K.reshape(B, Nk, num_heads, ds)
    Vh = V.reshape(B, Nk, num_heads, ds)
    logits = jnp.einsum('bqhd,bkhd->bhqk', Qh, Kh) / math.sqrt(D)
    A = jax.nn.softmax(logits, axis=-1)
    Oh = Qh + jnp.einsum('bhqk,bkhd->bqhd', A, Vh)
    O = Oh.reshape(B, Nq, D)
    return O + jnp.maximum(O @ Wo + bo, 0.0)


if __name__ == "__main__":
    # Small shapes consistent with the module: dim divisible by num_heads=6.
    B, Nk, D = 2, 8, 24
    NUM_HEADS = 6
    NUM_SEEDS = 4

    key = jax.random.PRNGKey(0)
    keys = jax.random.split(key, 11)

    # Input set X: (B, Nk, D)
    X = jax.random.normal(keys[0], (B, Nk, D), dtype=jnp.float32)

    # Seed parameter S: xavier_uniform on a (1, num_seeds, dim) tensor.
    fan_in, fan_out = NUM_SEEDS * D, 1 * D
    bound_s = math.sqrt(6.0 / (fan_in + fan_out))
    S = jax.random.uniform(keys[1], (NUM_SEEDS, D), jnp.float32,
                           minval=-bound_s, maxval=bound_s)

    # Linear layers (deterministic synthetic init, Kaiming-uniform-like bounds).
    def init_linear(kw, kb, din, dout):
        bw = 1.0 / math.sqrt(din)
        W = jax.random.uniform(kw, (din, dout), jnp.float32, -bw, bw)  # (in, out)
        b = jax.random.uniform(kb, (1, dout), jnp.float32, -bw, bw)
        return W, b

    Wq, bq = init_linear(keys[2], keys[3], D, D)
    Wk, bk = init_linear(keys[4], keys[5], D, D)
    Wv, bv = init_linear(keys[6], keys[7], D, D)
    Wo, bo = init_linear(keys[8], keys[9], D, D)

    ref = pma_reference(X, S, Wq, bq, Wk, bk, Wv, bv, Wo, bo,
                        num_heads=NUM_HEADS)

    # f32 path — tight check.
    out = pma_forward(X, S, Wq, bq, Wk, bk, Wv, bv, Wo, bo,
                      num_heads=NUM_HEADS, use_bf16=False)
    out = jax.block_until_ready(out)
    assert out.shape == (B, NUM_SEEDS, D)
    assert jnp.allclose(out, ref, atol=1e-4, rtol=1e-4), "f32 mismatch vs reference"

    # bf16 MXU-operand path (v6e/v7x fast path) — looser check, f32 accumulation.
    out_bf16 = pma_forward(X, S, Wq, bq, Wk, bk, Wv, bv, Wo, bo,
                           num_heads=NUM_HEADS, use_bf16=True)
    out_bf16 = jax.block_until_ready(out_bf16)
    assert jnp.allclose(out_bf16, ref, atol=1e-1, rtol=5e-2), "bf16 mismatch vs reference"

    print("KERNEL_OK")
</pallas_src>

<mosaic_0001>
module attributes {stable_mosaic.version = 11 : i64} {
  func.func @_pma_kernel(%arg0: i32, %arg1: memref<4x128xf32, #tpu.memory_space<vmem>>, %arg2: memref<8x128xf32, #tpu.memory_space<vmem>>, %arg3: memref<128x256xf32, #tpu.memory_space<vmem>>, %arg4: memref<1x256xf32, #tpu.memory_space<vmem>>, %arg5: memref<128x128xf32, #tpu.memory_space<vmem>>, %arg6: memref<1x128xf32, #tpu.memory_space<vmem>>, %arg7: memref<128x6xf32, #tpu.memory_space<vmem>>, %arg8: memref<1x4x128xf32, #tpu.memory_space<vmem>>) attributes {dimension_semantics = [#tpu.dimension_semantics<parallel>], iteration_bounds = array<i64: 2>, scalar_prefetch = 0 : i64, scratch_operands = 0 : i64, tpu.core_type = #tpu.core_type<tc>, window_params = [{pipeline_mode = #tpu.pipeline_mode<synchronous>, transform_indices = @transform_0, window_bounds = array<i64: 4, 128>}, {transform_indices = @transform_1, window_bounds = array<i64: 8, 128>}, {pipeline_mode = #tpu.pipeline_mode<synchronous>, transform_indices = @transform_2, window_bounds = array<i64: 128, 256>}, {pipeline_mode = #tpu.pipeline_mode<synchronous>, transform_indices = @transform_3, window_bounds = array<i64: 1, 256>}, {pipeline_mode = #tpu.pipeline_mode<synchronous>, transform_indices = @transform_4, window_bounds = array<i64: 128, 128>}, {pipeline_mode = #tpu.pipeline_mode<synchronous>, transform_indices = @transform_5, window_bounds = array<i64: 1, 128>}, {pipeline_mode = #tpu.pipeline_mode<synchronous>, transform_indices = @transform_6, window_bounds = array<i64: 128, 6>}, {transform_indices = @transform_7, window_bounds = array<i64: 1, 4, 128>}]} {
    %c0 = arith.constant 0 : index
    %c0_0 = arith.constant 0 : index
    %0 = vector.load %arg1[%c0, %c0_0] : memref<4x128xf32, #tpu.memory_space<vmem>>, vector<4x128xf32>
    %c0_1 = arith.constant 0 : index
    %c0_2 = arith.constant 0 : index
    %1 = vector.load %arg2[%c0_1, %c0_2] : memref<8x128xf32, #tpu.memory_space<vmem>>, vector<8x128xf32>
    %c0_3 = arith.constant 0 : index
    %c0_4 = arith.constant 0 : index
    %2 = vector.load %arg3[%c0_3, %c0_4] : memref<128x256xf32, #tpu.memory_space<vmem>>, vector<128x256xf32>
    %cst = arith.constant dense<0.000000e+00> : vector<8x256xf32>
    %3 = tpu.matmul %1, %2, %cst {dimension_numbers = #tpu.dot_dimension_numbers<[1], [0], [0], [1], [0, 0, 1, 1], [], []>} : vector<8x128xf32>, vector<128x256xf32>, vector<8x256xf32> -> vector<8x256xf32>
    %c0_5 = arith.constant 0 : index
    %c0_6 = arith.constant 0 : index
    %4 = vector.load %arg4[%c0_5, %c0_6] : memref<1x256xf32, #tpu.memory_space<vmem>>, vector<1x256xf32>
    %5 = vector.broadcast %4 : vector<1x256xf32> to vector<8x256xf32>
    %6 = arith.addf %3, %5 : vector<8x256xf32>
    %7 = vector.extract_strided_slice %6 {offsets = [0, 0], sizes = [8, 128], strides = [1, 1]} : vector<8x256xf32> to vector<8x128xf32>
    %8 = vector.shape_cast %7 : vector<8x128xf32> to vector<1x8x128xf32>
    %9 = vector.extract_strided_slice %6 {offsets = [0, 128], sizes = [8, 128], strides = [1, 1]} : vector<8x256xf32> to vector<8x128xf32>
    %10 = vector.shape_cast %9 : vector<8x128xf32> to vector<1x8x128xf32>
    %c0_7 = arith.constant 0 : index
    %c0_8 = arith.constant 0 : index
    %11 = vector.load %arg7[%c0_7, %c0_8] : memref<128x6xf32, #tpu.memory_space<vmem>>, vector<128x6xf32>
    %12 = vector.shape_cast %0 : vector<4x128xf32> to vector<1x4x1x128xf32>
    %13 = vector.shape_cast %8 : vector<1x8x128xf32> to vector<1x1x8x128xf32>
    %14 = vector.broadcast %12 : vector<1x4x1x128xf32> to vector<1x4x8x128xf32>
    %15 = vector.broadcast %13 : vector<1x1x8x128xf32> to vector<1x4x8x128xf32>
    %16 = arith.mulf %14, %15 : vector<1x4x8x128xf32>
    %17 = vector.shape_cast %16 : vector<1x4x8x128xf32> to vector<32x128xf32>
    %cst_9 = arith.constant dense<0.000000e+00> : vector<32x6xf32>
    %18 = tpu.matmul %17, %11, %cst_9 {dimension_numbers = #tpu.dot_dimension_numbers<[1], [0], [0], [1], [0, 0, 1, 1], [], []>} : vector<32x128xf32>, vector<128x6xf32>, vector<32x6xf32> -> vector<32x6xf32>
    %cst_10 = arith.constant 0.204124153 : f32
    %19 = vector.broadcast %cst_10 : f32 to vector<32x6xf32>
    %20 = arith.mulf %18, %19 : vector<32x6xf32>
    %21 = vector.shape_cast %20 : vector<32x6xf32> to vector<1x4x8x6xf32>
    %cst_11 = arith.constant dense<0xFF800000> : vector<1x4x6xf32>
    %22 = vector.multi_reduction <maximumf>, %21, %cst_11 [2] : vector<1x4x8x6xf32> to vector<1x4x6xf32>
    %23 = vector.shape_cast %22 : vector<1x4x6xf32> to vector<1x4x1x6xf32>
    %24 = vector.broadcast %23 : vector<1x4x1x6xf32> to vector<1x4x8x6xf32>
    %25 = arith.subf %21, %24 : vector<1x4x8x6xf32>
    %26 = math.exp %25 : vector<1x4x8x6xf32>
    %cst_12 = arith.constant dense<0.000000e+00> : vector<1x4x6xf32>
    %27 = vector.multi_reduction <add>, %26, %cst_12 [2] : vector<1x4x8x6xf32> to vector<1x4x6xf32>
    %28 = vector.shape_cast %27 : vector<1x4x6xf32> to vector<1x4x1x6xf32>
    %29 = tpu.reciprocal %28 : vector<1x4x1x6xf32> -> vector<1x4x1x6xf32>
    %30 = vector.broadcast %29 : vector<1x4x1x6xf32> to vector<1x4x8x6xf32>
    %31 = arith.mulf %26, %30 : vector<1x4x8x6xf32>
    %32 = vector.shape_cast %31 : vector<1x4x8x6xf32> to vector<32x6xf32>
    %cst_13 = arith.constant dense<0.000000e+00> : vector<32x128xf32>
    %33 = tpu.matmul %32, %11, %cst_13 {dimension_numbers = #tpu.dot_dimension_numbers<[1], [1], [0], [0], [0, 0, 1, 0], [], []>} : vector<32x6xf32>, vector<128x6xf32>, vector<32x128xf32> -> vector<32x128xf32>
    %34 = vector.shape_cast %33 : vector<32x128xf32> to vector<1x4x8x128xf32>
    %35 = vector.shape_cast %10 : vector<1x8x128xf32> to vector<1x1x8x128xf32>
    %36 = vector.broadcast %35 : vector<1x1x8x128xf32> to vector<1x4x8x128xf32>
    %37 = arith.mulf %34, %36 : vector<1x4x8x128xf32>
    %cst_14 = arith.constant dense<0.000000e+00> : vector<1x4x128xf32>
    %38 = vector.multi_reduction <add>, %37, %cst_14 [2] : vector<1x4x8x128xf32> to vector<1x4x128xf32>
    %39 = vector.shape_cast %0 : vector<4x128xf32> to vector<1x4x128xf32>
    %40 = arith.addf %39, %38 : vector<1x4x128xf32>
    %41 = vector.shape_cast %40 : vector<1x4x128xf32> to vector<4x128xf32>
    %c0_15 = arith.constant 0 : index
    %c0_16 = arith.constant 0 : index
    %42 = vector.load %arg5[%c0_15, %c0_16] : memref<128x128xf32, #tpu.memory_space<vmem>>, vector<128x128xf32>
    %cst_17 = arith.constant dense<0.000000e+00> : vector<4x128xf32>
    %43 = tpu.matmul %41, %42, %cst_17 {dimension_numbers = #tpu.dot_dimension_numbers<[1], [0], [0], [1], [0, 0, 1, 1], [], []>} : vector<4x128xf32>, vector<128x128xf32>, vector<4x128xf32> -> vector<4x128xf32>
    %c0_18 = arith.constant 0 : index
    %c0_19 = arith.constant 0 : index
    %44 = vector.load %arg6[%c0_18, %c0_19] : memref<1x128xf32, #tpu.memory_space<vmem>>, vector<1x128xf32>
    %45 = vector.broadcast %44 : vector<1x128xf32> to vector<4x128xf32>
    %46 = arith.addf %43, %45 : vector<4x128xf32>
    %47 = vector.shape_cast %46 : vector<4x128xf32> to vector<1x4x128xf32>
    %cst_20 = arith.constant 0.000000e+00 : f32
    %48 = vector.broadcast %cst_20 : f32 to vector<1x4x128xf32>
    %49 = arith.maximumf %47, %48 : vector<1x4x128xf32>
    %50 = arith.addf %40, %49 : vector<1x4x128xf32>
    %c0_21 = arith.constant 0 : index
    %c0_22 = arith.constant 0 : index
    %c0_23 = arith.constant 0 : index
    %51 = vector.load %arg8[%c0_21, %c0_22, %c0_23] : memref<1x4x128xf32, #tpu.memory_space<vmem>>, vector<1x4x128xf32>
    tpu.vector_store %arg8[%c0_21, %c0_22, %c0_23], %50 {strides = array<i32>} : memref<1x4x128xf32, #tpu.memory_space<vmem>>, vector<1x4x128xf32>,
    return
  }
  func.func @transform_0(%arg0: i32) -> (i32, i32) {
    %c0_i32 = arith.constant 0 : i32
    %c0_i32_0 = arith.constant 0 : i32
    %c0_i32_1 = arith.constant 0 : i32
    return %c0_i32, %c0_i32_0 : i32, i32
  }
  func.func @transform_1(%arg0: i32) -> (i32, i32) {
    %c0_i32 = arith.constant 0 : i32
    %c0_i32_0 = arith.constant 0 : i32
    return %arg0, %c0_i32 : i32, i32
  }
  func.func @transform_2(%arg0: i32) -> (i32, i32) {
    %c0_i32 = arith.constant 0 : i32
    %c0_i32_0 = arith.constant 0 : i32
    %c0_i32_1 = arith.constant 0 : i32
    return %c0_i32, %c0_i32_0 : i32, i32
  }
  func.func @transform_3(%arg0: i32) -> (i32, i32) {
    %c0_i32 = arith.constant 0 : i32
    %c0_i32_0 = arith.constant 0 : i32
    %c0_i32_1 = arith.constant 0 : i32
    return %c0_i32, %c0_i32_0 : i32, i32
  }
  func.func @transform_4(%arg0: i32) -> (i32, i32) {
    %c0_i32 = arith.constant 0 : i32
    %c0_i32_0 = arith.constant 0 : i32
    %c0_i32_1 = arith.constant 0 : i32
    return %c0_i32, %c0_i32_0 : i32, i32
  }
  func.func @transform_5(%arg0: i32) -> (i32, i32) {
    %c0_i32 = arith.constant 0 : i32
    %c0_i32_0 = arith.constant 0 : i32
    %c0_i32_1 = arith.constant 0 : i32
    return %c0_i32, %c0_i32_0 : i32, i32
  }
  func.func @transform_6(%arg0: i32) -> (i32, i32) {
    %c0_i32 = arith.constant 0 : i32
    %c0_i32_0 = arith.constant 0 : i32
    %c0_i32_1 = arith.constant 0 : i32
    return %c0_i32, %c0_i32_0 : i32, i32
  }
  func.func @transform_7(%arg0: i32) -> (i32, i32, i32) {
    %c0_i32 = arith.constant 0 : i32
    %c0_i32_0 = arith.constant 0 : i32
    %c0_i32_1 = arith.constant 0 : i32
    return %arg0, %c0_i32, %c0_i32_0 : i32, i32, i32
  }
}

</mosaic_0001>

<bundles_post_ra>
// kernel: tpu_custom_call.1
= control target key start
LH: loop header
LB: loop body
LE: loop exit
PB: predicated region body
PF: predicated region fallthrough
CT: control target
= control target key end

     0   :  { %12 = vsyncpa [#allocation3], 0  ;;  %s2061_s0 = inlined_call_operand.hbm [shape: f32[4,128], index: 0, kind: input, shape index: {}]   ;;  %s2062_s1 = inlined_call_operand.vmem [shape: f32[16,128], index: 1, kind: input, shape index: {}]   ;;  %s2063_s2 = inlined_call_operand.hbm [shape: f32[128,256], index: 2, kind: input, shape index: {}]   ;;  %s2064_s3 = inlined_call_operand.vmem [shape: f32[1,256], index: 3, kind: input, shape index: {}]   ;;  %s2065_s4 = inlined_call_operand.vmem [shape: f32[128,128], index: 4, kind: input, shape index: {}]   ;;  %s2066_s5 = inlined_call_operand.hbm [shape: f32[1,128], index: 5, kind: input, shape index: {}]   ;;  %s2067_s6 = inlined_call_operand.vmem [shape: f32[128,6], index: 6, kind: input, shape index: {}]   ;;  %s2068_s7 = inlined_call_operand.hbm [shape: f32[2,4,128], index: 7, kind: output, shape index: {}]  }
   0x1   :  { %13 = vsyncpa [#allocation6], 0 }
   0x2   :  { %14 = vsyncpa [#allocation4], 0 }
   0x3   :  { %16 = vsyncpa [#allocation4 + $0x1], 0  ;;  %s1686_s24 = smov 0   ;;  %s1688_s25 = smov 0  }
   0x4   :  { %s1690_s26 = smov 0   ;;  %s1692_s27 = smov 0  }
   0x5 LB: > { %2075 = sst [smem:[#allocation12_spill]] %s1630_s26  ;;  %s1707_s28 = sadd.s32 4294967295, %s1634_s27   ;;  %s1634_s27 = sphi %s1692_s27, %s2092_s27   ;;  %s1630_s26 = sphi %s1690_s26, %s2094_s26   ;;  %s1626_s25 = sphi %s1688_s25, %s2096_s25   ;;  %s1622_s24 = sphi %s1686_s24, %s2095_s24  }
   0x6   : > { %s1047_s29 = sadd.s32 4294967294, %s1634_s27   ;;  %s1711_s30 = sadd.s32 1, %s1634_s27  }
   0x7   : > { %2076 = sst [smem:[#allocation13_spill]] %s1711_s30  ;;  %s181_s8 = sadd.s32 1, %s1630_s26 }
   0x8   : > { %s178_s9 = ssub.s32 %s1634_s27, %s1711_s30  ;;  %p191_p0 = scmp.ne.s32.totalorder %s1630_s26, %s1626_s25 }
   0x9   : > { %p179_p1 = scmp.eq.s32.totalorder %s178_s9, 0  ;;  %p192_p2 = scmp.eq.s32.totalorder %s1707_s28, 1 }
   0xa   : > { %p197_p3 = scmp.ne.s32.totalorder %s1626_s25, %s1622_s24  ;;  %p198_p4 = scmp.eq.s32.totalorder %s1047_s29, 1 }
   0xb   : > { %s1722_s10 = scalar_select %p179_p1, %s1630_s26, %s181_s8  }
   0xc   : > { %p1724_p5 = por %p192_p2, %p191_p0  ;;  %p1728_p6 = por %p198_p4, %p197_p3 }
   0xd   : > { %2077 = sst [smem:[#allocation14_spill]] %s1722_s10  ;;  %p1048_p7 = scmp.ge.s32.totalorder %s1634_s27, 1 }
   0xe   : > { %s2078_s11 = scalar_select %p1724_p5, 1, 0 }
   0xf   : > { %s2079_s12 = scalar_select %p1728_p6, 1, 0 }
  0x10   : > { %p205_p8 = scmp.lt.s32.totalorder %s1634_s27, 3  ;;  %p2069_p9 = scmp.eq.s32.totalorder %s1707_s28, 0 }
  0x11   : > { %s1636_s14 = smov [#allocation5]   ;;  %s1637_s17 = smov [#allocation2]  }
  0x12   : > { %p1735_p10 = pnand %p1048_p7, %p205_p8  ;;  %s228_s15 = sshll.u32 %s1636_s14, 4  ;;  %s1741_s15 = int_to_ptr.vmem [resolvable:$true] %s228_s15 }
  0x13   : > { %s218_s18 = sshll.u32 %s1637_s17, 4  ;;  %s1638_s19 = smov [#allocation7]   ;;  %s1749_s18 = int_to_ptr.vmem [resolvable:$true] %s218_s18 }
  0x14   : > { %s2080_s13 = scalar_select %p1735_p10, 1, 0 }
  0x15   : > { %p1402_p11 = pneg %p1735_p10  ;;  %s1751_s20 = sshll.u32 %s1638_s19, 4  ;;  %s249_s20 = int_to_ptr.vmem [resolvable:$true] %s1751_s20 }
  0x16   : > { %s1480_s23 = scalar_lea.hbm %s2063_s2, 4096 }
  0x17   : > { %p1745_p12 = pnand %p2069_p9, %p1402_p11  ;;  %p1481_p13 = scmp.ne.s32.totalorder %s2063_s2, %s1480_s23 }
  0x18   : > { %p1487_p3 = scmp.lt.u32.totalorder %s1480_s23, %s2063_s2 }
  0x19   : > { %p1761_p0 = pneg %p1745_p12 }
  0x1b   : > { %p1483_p1 = pnand %p1761_p0, %p1481_p13 }
  0x1d   : > { %p1484_p2 = pneg %p1483_p1 }
  0x1f   : > { %p1489_p4 = pnand %p1487_p3, %p1484_p2 }
  0x21   : > { %1492 = shalt.err (!%p1489_p4)
}
  0x22   : > { %s1493_s19 = scalar_lea.vmem %s1741_s15, 4096  ;;  %p1501_p9 = scmp.lt.s32.totalorder %s1741_s15, %s1741_s15 }
  0x23   : > { %p1494_p7 = scmp.ne.s32.totalorder %s1741_s15, %s1493_s19  ;;  %p1502_p6 = scmp.lt.s32.totalorder %s1493_s19, %s1493_s19 }
  0x25   : > { %p1496_p8 = pnand %p1494_p7, %p1761_p0  ;;  %p1503_p13 = por %p1502_p6, %p1501_p9 }
  0x27   : > { %p1497_p11 = pneg %p1496_p8 }
  0x29   : > { %p1504_p1 = pnand %p1503_p13, %p1497_p11 }
  0x2b   : > { %1507 = shalt.err (!%p1504_p1)
}
  0x2c   : > { %s1639_s21 = smov 256   ;;  %s1640_s22 = smov 16  }
  0x2d   : > { %1408 = dma.hbm_to_vmem [thread:$0]  (!%p1745_p12), %s2063_s2, 4096, %s1741_s15, [#allocation6], %s1639_s21, %s1639_s21, %s1640_s22  }
  0x2e   : > { %s1508_s17 = scalar_lea.hbm %s2061_s0, 64 }
  0x2f   : > { %p1509_p6 = scmp.ne.s32.totalorder %s2061_s0, %s1508_s17  ;;  %p1515_p3 = scmp.lt.u32.totalorder %s1508_s17, %s2061_s0 }
  0x31   : > { %p1511_p9 = pnand %p1509_p6, %p1761_p0 }
  0x33   : > { %p1512_p2 = pneg %p1511_p9 }
  0x35   : > { %p1517_p4 = pnand %p1515_p3, %p1512_p2 }
  0x37   : > { %1520 = shalt.err (!%p1517_p4)
}
  0x38   : > { %s1521_s15 = scalar_lea.vmem %s1749_s18, 64  ;;  %p1529_p13 = scmp.lt.s32.totalorder %s1749_s18, %s1749_s18 }
  0x39   : > { %p1522_p7 = scmp.ne.s32.totalorder %s1749_s18, %s1521_s15  ;;  %p1530_p1 = scmp.lt.s32.totalorder %s1521_s15, %s1521_s15 }
  0x3b   : > { %p1524_p8 = pnand %p1522_p7, %p1761_p0  ;;  %p1531_p6 = por %p1530_p1, %p1529_p13 }
  0x3d   : > { %p1525_p11 = pneg %p1524_p8 }
  0x3f   : > { %p1532_p9 = pnand %p1531_p6, %p1525_p11 }
  0x41   : > { %1535 = shalt.err (!%p1532_p9)
}
  0x42   : > { %1405 = dma.hbm_to_vmem [thread:$0]  (!%p1745_p12), %s2061_s0, 64, %s1749_s18, [#allocation3]  }
  0x43   : > { %s1536_s22 = scalar_lea.hbm %s2066_s5, 16 }
  0x44   : > { %p1537_p2 = scmp.ne.s32.totalorder %s2066_s5, %s1536_s22  ;;  %p1543_p7 = scmp.lt.u32.totalorder %s1536_s22, %s2066_s5 }
  0x46   : > { %p1539_p3 = pnand %p1537_p2, %p1761_p0 }
  0x48   : > { %p1540_p4 = pneg %p1539_p3 }
  0x4a   : > { %p1545_p8 = pnand %p1543_p7, %p1540_p4 }
  0x4c   : > { %1548 = shalt.err (!%p1545_p8)
}
  0x4d   : > { %s1549_s17 = scalar_lea.vmem %s249_s20, 16  ;;  %s1556_s18 = scalar_lea.vmem %s249_s20, 32 }
  0x4e   : > { %p1550_p11 = scmp.ne.s32.totalorder %s249_s20, %s1549_s17  ;;  %p1557_p6 = scmp.lt.s32.totalorder %s249_s20, %s249_s20 }
  0x4f   : > { %p1558_p9 = scmp.lt.s32.totalorder %s1556_s18, %s1549_s17 }
  0x50   : > { %p1552_p13 = pnand %p1550_p11, %p1761_p0 }
  0x51   : > { %p1559_p5 = por %p1558_p9, %p1557_p6 }
  0x52   : > { %p1553_p1 = pneg %p1552_p13 }
  0x54   : > { %p1560_p10 = pnand %p1559_p5, %p1553_p1 }
  0x56   : > { %1563 = shalt.err (!%p1560_p10)
}
  0x57   : > { %1411 = dma.hbm_to_vmem [thread:$0]  (!%p1745_p12), %s2066_s5, 16, %s249_s20, [#allocation6]  }
  0x58   : > { %p2083_p2 = scmp.ne.s32.totalorder %s2080_s13, 0 }
  0x59   : > { %p2084_p3 = scmp.eq.s32.totalorder (!%p2083_p2), %s1707_s28, 0 }
  0x5a   : > { %271 = sbr.rel (%p2083_p2) target bundleno = 1091 (0x443), region = 48 }
  0x61   : > { %1609 = dma.done.wait (%p2084_p3), [#allocation3], 64   ;;  %p2085_p0 = pmov %p2084_p3 }
  0x63   : > { %1611 = vsyncadd (%p2085_p0), [#allocation3], 4294967232  ;;  %p2086_p4 = pmov %p2085_p0 }
  0x64   : > { %p2087_p5 = pmov %p2085_p0 }
  0x65   : > { %1613 = dma.done.wait (%p2086_p4), [#allocation6], 4112  }
  0x66   : > { %1615 = vsyncadd (%p2087_p5), [#allocation6], 4294963184  ;;  %v1641_v0 = vmov 0.0   ;;  %v317_v1 = vld [vmem:[#allocation5 + $0x8] sm:$0xff]  ;;  %v319_v2 = vld [vmem:[#allocation5 + $0x18] sm:$0xff]  ;;  %p310_p10 = scmp.lt.s32.totalorder %s1707_s28, 1 }
  0x67   : > { %424 = vmatprep.mubr.f32.mxu1 %v1641_v0  ;;  %v316_v3 = vld [vmem:[#allocation5] sm:$0xff]  ;;  %v1252_v4 = vpack.c.bf16 %v319_v2, %v317_v1  ;;  %v318_v5 = vld [vmem:[#allocation5 + $0x10] sm:$0xff]  ;;  %v321_v6 = vld [vmem:[#allocation5 + $0x28] sm:$0xff]  ;;  %vm585_vm0 = vcmask 48128   ;;  %vm1644_vm2 = vmmov 0   ;;  %vm839_vm3 = vcmask 1041409  }
  0x68   : > { %v323_v7 = vld [vmem:[#allocation5 + $0x38] sm:$0xff]  ;;  %v1254_v8 = vpack.c.bf16 %v318_v5, %v316_v3  ;;  %v320_v10 = vld [vmem:[#allocation5 + $0x20] sm:$0xff]  ;;  %v322_v11 = vld [vmem:[#allocation5 + $0x30] sm:$0xff]  ;;  %s311_s13 = scalar_select %p310_p10, %s1707_s28, 1  ;;  %vm841_vm4 = vcmask 1042434   ;;  %vm843_vm5 = vcmask 1043459  }
  0x69   : > { %v1256_v9 = vpack.c.bf16 %v323_v7, %v321_v6  ;;  %v325_v12 = vld [vmem:[#allocation5 + $0x48] sm:$0xff]  ;;  %1253 = vmatprep.subr.bf16.mxu1 %v1252_v4  ;;  %v327_v13 = vld [vmem:[#allocation5 + $0x58] sm:$0xff]  ;;  %v1258_v14 = vpack.c.bf16 %v322_v11, %v320_v10  ;;  %v324_v16 = vld [vmem:[#allocation5 + $0x40] sm:$0xff]  ;;  %s307_s9 = sand.u32 1, %s1626_s25   ;;  %s1081_s30 = sshll.u32 %s1707_s28, 6 }
  0x6a   : > { %1255 = vmatpush1.bf16.msra.mxu1 %v1254_v8  ;;  %v1260_v15 = vpack.c.bf16 %v327_v13, %v325_v12  ;;  %v326_v17 = vld [vmem:[#allocation5 + $0x50] sm:$0xff]  ;;  %v329_v18 = vld [vmem:[#allocation5 + $0x68] sm:$0xff]  ;;  %v331_v19 = vld [vmem:[#allocation5 + $0x78] sm:$0xff]  ;;  %s1058_s16 = sshll.u32 %s311_s13, 3  ;;  %v350_v12 = vlaneseq  ;;  %v1642_v13 = vmov 1966171168   ;;  %s2019_s29 = scalar_lea.hbm %s2068_s7, %s1081_s30 }
  0x6b   : > { %1257 = vmatprep.subr.bf16.mxu1 %v1256_v9  ;;  %v1262_v20 = vpack.c.bf16 %v326_v17, %v324_v16  ;;  %v1264_v21 = vpack.c.bf16 %v331_v19, %v329_v18  ;;  %v328_v22 = vld [vmem:[#allocation5 + $0x60] sm:$0xff]  ;;  %v330_v23 = vld [vmem:[#allocation5 + $0x70] sm:$0xff]  ;;  %v333_v24 = vld [vmem:[#allocation5 + $0x88] sm:$0xff]  ;;  %s313_s22 = scalar_lea.vmem %s2062_s1, %s1058_s16  ;;  %s1057_s26 = sshll.u32 %s307_s9, 2 }
  0x6c   : > { %v335_v25 = vld [vmem:[#allocation5 + $0x98] sm:$0xff]  ;;  %v1266_v26 = vpack.c.bf16 %v330_v23, %v328_v22  ;;  %v332_v28 = vld [vmem:[#allocation5 + $0x80] sm:$0xff]  ;;  %v334_v29 = vld [vmem:[#allocation5 + $0x90] sm:$0xff]  ;;  %s309_s10 = scalar_lea.vmem [#allocation8], %s1057_s26  ;;  %s944_s8 = scalar_lea.sflag [#allocation4], %s307_s9 }
  0x6d   : > { %v1268_v27 = vpack.c.bf16 %v335_v25, %v333_v24  ;;  %v337_v30 = vld [vmem:[#allocation5 + $0xa8] sm:$0xff]  ;;  %v339_v31 = vld [vmem:[#allocation5 + $0xb8] sm:$0xff]  ;;  %v1270_v32 = vpack.c.bf16 %v334_v29, %v332_v28  ;;  %v336_v34 = vld [vmem:[#allocation5 + $0xa0] sm:$0xff]  ;;  %s957_s21 = sshll.u32 %s309_s10, 4  ;;  %p2090_p7 = scmp.ne.s32.totalorder %s2078_s11, 0  ;;  %s2021_s21 = int_to_ptr.vmem [resolvable:$true] %s957_s21 }
  0x6e   : > { %1259 = vmatpush1.bf16.msra.mxu1 %v1258_v14  ;;  %v1272_v33 = vpack.c.bf16 %v339_v31, %v337_v30  ;;  %v338_v35 = vld [vmem:[#allocation5 + $0xb0] sm:$0xff]  ;;  %v341_v36 = vld [vmem:[#allocation5 + $0xc8] sm:$0xff]  ;;  %v343_v37 = vld [vmem:[#allocation5 + $0xd8] sm:$0xff]  ;;  %v449_v14 = vunpack.c.l.s4 %v1642_v13  ;;  %s1564_s14 = scalar_lea.vmem %s2021_s21, 64  ;;  %s1645_s28 = smov [#allocation8]  }
  0x6f   : > { %1261 = vmatprep.subr.bf16.mxu1 %v1260_v15  ;;  %v1274_v38 = vpack.c.bf16 %v338_v35, %v336_v34  ;;  %v1276_v39 = vpack.c.bf16 %v343_v37, %v341_v36  ;;  %v340_v40 = vld [vmem:[#allocation5 + $0xc0] sm:$0xff]  ;;  %v342_v41 = vld [vmem:[#allocation5 + $0xd0] sm:$0xff]  ;;  %v345_v42 = vld [vmem:[#allocation5 + $0xe8] sm:$0xff]  ;;  %v1926_v15 = vshrl.u32 %v350_v12, 7  ;;  %p1565_p12 = scmp.ne.s32.totalorder %s2021_s21, %s1564_s14  ;;  %s1568_s17 = sshll.u32 %s1645_s28, 4  ;;  %s1569_s17 = int_to_ptr.vmem [resolvable:$false] %s1568_s17 }
  0x70   : > { %v347_v43 = vld [vmem:[#allocation5 + $0xf8] sm:$0xff]  ;;  %v1278_v44 = vpack.c.bf16 %v342_v41, %v340_v40  ;;  %v344_v46 = vld [vmem:[#allocation5 + $0xe0] sm:$0xff]  ;;  %v346_v47 = vld [vmem:[#allocation5 + $0xf0] sm:$0xff]  ;;  %v450_v16 = vunpack.c.0.s8 %v449_v14  ;;  %s1570_s18 = scalar_lea.vmem %s1569_s17, 128  ;;  %p1571_p13 = scmp.lt.s32.totalorder %s2021_s21, %s1569_s17 }
  0x71   : > { %v1280_v45 = vpack.c.bf16 %v347_v43, %v345_v42  ;;  %v431_v48 = vld [vmem:[%s2067_s6] sm:$0xff]  ;;  %v432_v49 = vld [vmem:[%s2067_s6 + $0x8] sm:$0xff]  ;;  %v1282_v50 = vpack.c.bf16 %v346_v47, %v344_v46  ;;  %v433_v52 = vld [vmem:[%s2067_s6 + $0x10] sm:$0xff]  ;;  %v1643_v42 = vmov 0.0|0.0   ;;  %p1566_p8 = pnand %p1565_p12, %p2090_p7  ;;  %p1572_p1 = scmp.lt.s32.totalorder %s1570_s18, %s1564_s14 }
  0x72   : > { %1263 = vmatpush1.bf16.msra.mxu1 %v1262_v20  ;;  %v1284_v51 = vpack.c.bf16 %v432_v49, %v431_v48  ;;  %v434_v53 = vld [vmem:[%s2067_s6 + $0x18] sm:$0xff]  ;;  %v315_v54 = vld [vmem:[%s313_s22] sm:$0xff]  ;;  %v436_v57 = vld [vmem:[%s2067_s6 + $0x28] sm:$0xff]  ;;  %v453_v17 = vsub.s32 %v450_v16, %v1926_v15 }
  0x73   : > { %1265 = vmatprep.subr.bf16.mxu1 %v1264_v21  ;;  %v1288_v55 = vpack.c.bf16 %v434_v53, %v433_v52  ;;  %v435_v56 = vld [vmem:[%s2067_s6 + $0x20] sm:$0xff]  ;;  %v437_v59 = vld [vmem:[%s2067_s6 + $0x30] sm:$0xff]  ;;  %v438_v60 = vld [vmem:[%s2067_s6 + $0x38] sm:$0xff]  ;;  %v352_v21 = vsub.s32 0, %v1926_v15  ;;  %p1567_p11 = pneg %p1566_p8  ;;  %p1573_p6 = por %p1572_p1, %p1571_p13 }
  0x74   : > { %v1292_v58 = vpack.c.bf16 %v436_v57, %v435_v56  ;;  %v1296_v61 = vpack.c.bf16 %v438_v60, %v437_v59  ;;  %v439_v62 = vld [vmem:[%s2067_s6 + $0x40] sm:$0xff]  ;;  %v440_v63 = vld [vmem:[%s2067_s6 + $0x48] sm:$0xff]  ;;  %v441_v2 = vld [vmem:[%s2067_s6 + $0x50] sm:$0xff] }
  0x75   : > { %v1300_v1 = vpack.c.bf16 %v440_v63, %v439_v62  ;;  %v442_v3 = vld [vmem:[%s2067_s6 + $0x58] sm:$0xff]  ;;  %v443_v5 = vld [vmem:[%s2067_s6 + $0x60] sm:$0xff]  ;;  %v444_v6 = vld [vmem:[%s2067_s6 + $0x68] sm:$0xff]  ;;  %p1574_p9 = pnand %p1573_p6, %p1567_p11 }
  0x76   : > { %1267 = vmatpush1.bf16.msra.mxu1 %v1266_v26  ;;  %v1304_v4 = vpack.c.bf16 %v442_v3, %v441_v2  ;;  %v1308_v7 = vpack.c.bf16 %v444_v6, %v443_v5  ;;  %v445_v8 = vld [vmem:[%s2067_s6 + $0x70] sm:$0xff]  ;;  %v446_v9 = vld [vmem:[%s2067_s6 + $0x78] sm:$0xff]  ;;  %vm1890_vm1 = vmpackc.low %vm585_vm0, %vm585_vm0 }
  0x77   : > { %1269 = vmatprep.subr.bf16.mxu1 %v1268_v27  ;;  %v1312_v10 = vpack.c.bf16 %v446_v9, %v445_v8  ;;  %1318 = vmatprep.subr.msk.bf16.mxu0 %vm1890_vm1, %v1284_v51  ;;  %v1929_v18 = vld [vmem:[#allocation2] sm:$0xf]  ;;  %v848_v40 = vld [vmem:[%s2065_s4 + $0x8] sm:$0xff]  ;;  %v849_v41 = vld [vmem:[%s2065_s4 + $0x10] sm:$0xff] }
  0x78   : > { %1321 = vmatpush3.bf16.xpose.msk.msra.mxu0 %vm1890_vm1, %v1284_v51  ;;  %v454_v19 = vrot.slane %v1929_v18, %v453_v17  ;;  %v1936_v23 = vld [vmem:[%s2064_s3] sm:$0x3] }
  0x79   : > { %1324 = vmatprep.subr.msk.bf16.mxu0 %vm1890_vm1, %v1288_v55  ;;  %v353_v25 = vrot.slane %v1936_v23, %v352_v21 }
  0x7a   : > { %1271 = vmatpush1.bf16.msra.mxu1 %v1270_v32  ;;  %v455_v20 = vcombine.high %v454_v19, %v454_v19  ;;  %v462_v22 = vrot.slane %v454_v19, %v453_v17 }
  0x7b   : > { %1273 = vmatprep.subr.bf16.mxu1 %v1272_v33 }
  0x7c   : > { %v469_v24 = vrot.slane %v455_v20, %v453_v17  ;;  %v470_v26 = vcombine.high %v462_v22, %v462_v22  ;;  %v475_v27 = vrot.slane %v462_v22, %v352_v21 }
  0x7e   : > { %1275 = vmatpush1.bf16.msra.mxu1 %v1274_v38  ;;  %v479_v28 = vrot.slane %v469_v24, %v352_v21  ;;  %v471_v30 = vcombine.high %v469_v24, %v469_v24  ;;  %v483_v33 = vrot.slane %v470_v26, %v352_v21 }
  0x7f   : > { %1277 = vmatprep.subr.bf16.mxu1 %v1276_v39  ;;  %v847_v39 = vld [vmem:[%s2065_s4] sm:$0xff] }
  0x80   : > { %1327 = vmatpush3.bf16.xpose.msk.msra.mxu0 %vm1890_vm1, %v1288_v55  ;;  %v487_v36 = vrot.slane %v471_v30, %v352_v21  ;;  %v1365_v43 = vpack.c.bf16 %v848_v40, %v847_v39 }
  0x81   : > { %1330 = vmatprep.subr.msk.bf16.mxu0 %vm1890_vm1, %v1292_v58 }
  0x82   : > { %1279 = vmatpush1.bf16.msra.mxu1 %v1278_v44  ;;  %v850_v44 = vld [vmem:[%s2065_s4 + $0x18] sm:$0xff] }
  0x83   : > { %1281 = vmatprep.subr.bf16.mxu1 %v1280_v45  ;;  %v1368_v45 = vpack.c.bf16 %v850_v44, %v849_v41 }
  0x86   : > { %1283 = vmatpush1.bf16.msra.mxu1 %v1282_v50 }
  0x87   : > { %1285 = vmatprep.subr.bf16.mxu1 %v1284_v51 }
  0x88   : > { %1333 = vmatpush3.bf16.xpose.msk.msra.mxu0 %vm1890_vm1, %v1292_v58 }
  0x89   : > { %425 = vmatmul.mubr.f32.vlgmr.msra.gmra.mrb[0].mxu1 %v315_v54  ;;  %1336 = vmatprep.subr.msk.bf16.mxu0 %vm1890_vm1, %v1296_v61 }
  0x8a   : > { %1287 = vmatpush3.bf16.msra.mxu1 %v1284_v51 }
  0x8b   : > { %1289 = vmatprep.subr.bf16.mxu1 %v1288_v55 }
  0x8e   : > { %1291 = vmatpush3.bf16.msra.mxu1 %v1288_v55 }
  0x8f   : > { %1293 = vmatprep.subr.bf16.mxu1 %v1292_v58 }
  0x90   : > { %1339 = vmatpush3.bf16.xpose.msk.msra.mxu0 %vm1890_vm1, %v1296_v61 }
  0x91   : > { %1342 = vmatprep.subr.msk.bf16.mxu0 %vm1890_vm1, %v1300_v1 }
  0x92   : > { %1295 = vmatpush3.bf16.msra.mxu1 %v1292_v58 }
  0x93   : > { %1297 = vmatprep.subr.bf16.mxu1 %v1296_v61 }
  0x96   : > { %1299 = vmatpush3.bf16.msra.mxu1 %v1296_v61 }
  0x97   : > { %1301 = vmatprep.subr.bf16.mxu1 %v1300_v1 }
  0x98   : > { %1345 = vmatpush3.bf16.xpose.msk.msra.mxu0 %vm1890_vm1, %v1300_v1 }
  0x99   : > { %1348 = vmatprep.subr.msk.bf16.mxu0 %vm1890_vm1, %v1304_v4 }
  0x9a   : > { %1303 = vmatpush3.bf16.msra.mxu1 %v1300_v1 }
  0x9b   : > { %1305 = vmatprep.subr.bf16.mxu1 %v1304_v4 }
  0x9e   : > { %1307 = vmatpush3.bf16.msra.mxu1 %v1304_v4 }
  0x9f   : > { %1309 = vmatprep.subr.bf16.mxu1 %v1308_v7 }
  0xa0   : > { %1351 = vmatpush3.bf16.xpose.msk.msra.mxu0 %vm1890_vm1, %v1304_v4 }
  0xa1   : > { %1354 = vmatprep.subr.msk.bf16.mxu0 %vm1890_vm1, %v1308_v7 }
  0xa2   : > { %1311 = vmatpush3.bf16.msra.mxu1 %v1308_v7 }
  0xa3   : > { %1313 = vmatprep.subr.bf16.mxu1 %v1312_v10 }
  0xa6   : > { %1315 = vmatpush3.bf16.msra.mxu1 %v1312_v10 }
  0xa7   : > { %1364 = vmatprep.subr.bf16.mxu1 %v1643_v42 }
  0xa8   : > { %1357 = vmatpush3.bf16.xpose.msk.msra.mxu0 %vm1890_vm1, %v1308_v7 }
  0xa9   : > { %1360 = vmatprep.subr.msk.bf16.mxu0 %vm1890_vm1, %v1312_v10 }
  0xb0   : > { %1363 = vmatpush3.bf16.xpose.msk.msra.mxu0 %vm1890_vm1, %v1312_v10 }
 0x15c   : > { %v426_v29 = vpop.f32.mrb[0].mxu1 }
 0x15d   : > { %v427_v31 = vadd.f32 %v426_v29, %v353_v25  ;;  %v1939_v32 = vpop.f32.mrb[1].mxu1 }
 0x15f   : > { %v492_v34 = vmul.f32 %v475_v27, %v427_v31  ;;  %v493_v35 = vmul.f32 %v479_v28, %v427_v31  ;;  %v494_v37 = vmul.f32 %v483_v33, %v427_v31  ;;  %v495_v38 = vmul.f32 %v487_v36, %v427_v31 }
 0x161   : > { %1173 = vmatprep.mubr.f32.mxu1 %v492_v34 }
 0x162   : > { %1174 = vmatmul.mubr.f32.vlgmr.msra.gmra.mrb[2].mxu1 %v493_v35 }
 0x163   : > { %1176 = vmatprep.mubr.f32.mxu1 %v494_v37  ;;  %1366 = vmatpush3.bf16.msra.mxu1 %v1365_v43 }
 0x164   : > { %1367 = vmatprep.subr.bf16.mxu1 %v1643_v42 }
 0x166   : > { %1177 = vmatmul.mubr.f32.gmra.mrb[4].mxu1 %v495_v38 }
 0x167   : > { %1369 = vmatpush3.bf16.msra.mxu1 %v1368_v45  ;;  %1249 = vmatprep.mubr.msk.f32.mxu1 %vm1644_vm2, %v1641_v0 }
 0x168   : > { %1370 = vmatprep.subr.bf16.mxu1 %v1643_v42 }
 0x235   : > { %v1175_v46 = vpop.f32.mrb[2].mxu1 }
 0x236   : > { %v582_v47 = vmul.f32 0.20412415, %v1175_v46  ;;  %v562_v48 = vpop.f32.mrb[3].mxu1 }
 0x237   : > { %v581_v49 = vmul.f32 0.20412415, %v562_v48 }
 0x238   : > { %v593_v50 = vsel %vm585_vm0, %v582_v47, -inf }
 0x239   : > { %v594_v51 = vrot.slane %v593_v50, 4  ;;  %v586_v52 = vsel %vm585_vm0, %v581_v49, -inf  ;;  %v1178_v53 = vpop.f32.mrb[4].mxu1 }
 0x23a   : > { %v587_v54 = vrot.slane %v586_v52, 4  ;;  %v584_v55 = vmul.f32 0.20412415, %v1178_v53  ;;  %v572_v56 = vpop.f32.mrb[5].mxu1 }
 0x23b   : > { %v595_v57 = vmax.f32 %v593_v50, %v594_v51  ;;  %v583_v58 = vmul.f32 0.20412415, %v572_v56 }
 0x23c   : > { %v588_v59 = vmax.f32 %v586_v52, %v587_v54  ;;  %v607_v60 = vsel %vm585_vm0, %v584_v55, -inf }
 0x23d   : > { %v596_v61 = vrot.slane %v595_v57, 2  ;;  %v608_v62 = vrot.slane %v607_v60, 4  ;;  %v600_v63 = vsel %vm585_vm0, %v583_v58, -inf }
 0x23e   : > { %v589_v1 = vrot.slane %v588_v59, 2  ;;  %v601_v2 = vrot.slane %v600_v63, 4 }
 0x23f   : > { %v597_v3 = vmax.f32 %v595_v57, %v596_v61  ;;  %v609_v4 = vmax.f32 %v607_v60, %v608_v62 }
 0x240   : > { %v590_v5 = vmax.f32 %v588_v59, %v589_v1  ;;  %v602_v6 = vmax.f32 %v600_v63, %v601_v2 }
 0x241   : > { %v598_v7 = vrot.slane %v597_v3, 1  ;;  %v610_v8 = vrot.slane %v609_v4, 2 }
 0x242   : > { %v591_v9 = vrot.slane %v590_v5, 1  ;;  %v603_v10 = vrot.slane %v602_v6, 2 }
 0x243   : > { %v599_v11 = vmax.f32 %v597_v3, %v598_v7  ;;  %v611_v12 = vmax.f32 %v609_v4, %v610_v8 }
 0x244   : > { %v592_v13 = vmax.f32 %v590_v5, %v591_v9  ;;  %v604_v14 = vmax.f32 %v602_v6, %v603_v10  ;;  %v851_v9 = vld [vmem:[%s2065_s4 + $0x20] sm:$0xff]  ;;  %v852_v10 = vld [vmem:[%s2065_s4 + $0x28] sm:$0xff] }
 0x245   : > { %v615_v16 = vsub.f32 %v582_v47, %v599_v11  ;;  %v612_v17 = vrot.slane %v611_v12, 1  ;;  %v1371_v11 = vpack.c.bf16 %v852_v10, %v851_v9 }
 0x246   : > { %v614_v19 = vsub.f32 %v581_v49, %v592_v13  ;;  %v605_v20 = vrot.slane %v604_v14, 1  ;;  %v854_v13 = vld [vmem:[%s2065_s4 + $0x38] sm:$0xff] }
 0x247   : > { %v620_v21 = vmul.f32 1.442695, %v615_v16  ;;  %v613_v22 = vmax.f32 %v611_v12, %v612_v17  ;;  %1372 = vmatpush3.bf16.msra.mxu1 %v1371_v11  ;;  %v853_v12 = vld [vmem:[%s2065_s4 + $0x30] sm:$0xff]  ;;  %v855_v16 = vld [vmem:[%s2065_s4 + $0x40] sm:$0xff]  ;;  %v856_v17 = vld [vmem:[%s2065_s4 + $0x48] sm:$0xff] }
 0x248   : > { %v618_v24 = vmul.f32 1.442695, %v614_v19  ;;  %v606_v25 = vmax.f32 %v604_v14, %v605_v20  ;;  %1373 = vmatprep.subr.bf16.mxu1 %v1643_v42  ;;  %v1374_v14 = vpack.c.bf16 %v854_v13, %v853_v12  ;;  %v1377_v19 = vpack.c.bf16 %v856_v17, %v855_v16  ;;  %v857_v20 = vld [vmem:[%s2065_s4 + $0x50] sm:$0xff] }
 0x249   : > { %1464 = vpow2.f32 %v620_v21  ;;  %v617_v26 = vsub.f32 %v584_v55, %v613_v22  ;;  %v858_v21 = vld [vmem:[%s2065_s4 + $0x58] sm:$0xff] }
 0x24a   : > { %1466 = vpow2.f32 %v618_v24  ;;  %v616_v27 = vsub.f32 %v583_v58, %v606_v25  ;;  %v1380_v22 = vpack.c.bf16 %v858_v21, %v857_v20  ;;  %v859_v24 = vld [vmem:[%s2065_s4 + $0x60] sm:$0xff]  ;;  %v860_v25 = vld [vmem:[%s2065_s4 + $0x68] sm:$0xff] }
 0x24b   : > { %v624_v28 = vmul.f32 1.442695, %v617_v26  ;;  %1375 = vmatpush3.bf16.msra.mxu1 %v1374_v14  ;;  %v1383_v26 = vpack.c.bf16 %v860_v25, %v859_v24 }
 0x24c   : > { %v622_v29 = vmul.f32 1.442695, %v616_v27  ;;  %1376 = vmatprep.subr.bf16.mxu1 %v1643_v42  ;;  %v861_v27 = vld [vmem:[%s2065_s4 + $0x70] sm:$0xff] }
 0x24d   : > { %1468 = vpow2.f32 %v624_v28  ;;  %v862_v28 = vld [vmem:[%s2065_s4 + $0x78] sm:$0xff] }
 0x24e   : > { %1470 = vpow2.f32 %v622_v29  ;;  %v1386_v29 = vpack.c.bf16 %v862_v28, %v861_v27 }
 0x24f   : > { %1378 = vmatpush3.bf16.msra.mxu1 %v1377_v19 }
 0x250   : > { %1379 = vmatprep.subr.bf16.mxu1 %v1643_v42 }
 0x253   : > { %v1465_v30 = vpop.eup %1464  ;;  %1381 = vmatpush3.bf16.msra.mxu1 %v1380_v22 }
 0x254   : > { %v1467_v31 = vpop.eup %1466  ;;  %v633_v33 = vsel %vm585_vm0, %v1465_v30, 0.0  ;;  %1382 = vmatprep.subr.bf16.mxu1 %v1643_v42 }
 0x255   : > { %v634_v34 = vrot.slane %v633_v33, 4  ;;  %v626_v35 = vsel %vm585_vm0, %v1467_v31, 0.0 }
 0x256   : > { %v627_v36 = vrot.slane %v626_v35, 4 }
 0x257   : > { %v1469_v37 = vpop.eup %1468  ;;  %v635_v38 = vadd.f32 %v634_v34, %v633_v33  ;;  %1384 = vmatpush3.bf16.msra.mxu1 %v1383_v26 }
 0x258   : > { %v1471_v39 = vpop.eup %1470  ;;  %v628_v40 = vadd.f32 %v627_v36, %v626_v35  ;;  %v647_v41 = vsel %vm585_vm0, %v1469_v37, 0.0  ;;  %1385 = vmatprep.subr.bf16.mxu1 %v1643_v42 }
 0x259   : > { %v636_v43 = vrot.slane %v635_v38, 2  ;;  %v648_v44 = vrot.slane %v647_v41, 4  ;;  %v640_v45 = vsel %vm585_vm0, %v1471_v39, 0.0 }
 0x25a   : > { %v641_v46 = vrot.slane %v640_v45, 4  ;;  %v629_v47 = vrot.slane %v628_v40, 2 }
 0x25b   : > { %v637_v48 = vadd.f32 %v636_v43, %v635_v38  ;;  %v649_v49 = vadd.f32 %v648_v44, %v647_v41  ;;  %1387 = vmatpush3.bf16.msra.mxu1 %v1386_v29 }
 0x25c   : > { %v642_v50 = vadd.f32 %v641_v46, %v640_v45  ;;  %v630_v51 = vadd.f32 %v629_v47, %v628_v40 }
 0x25d   : > { %v638_v52 = vrot.slane %v637_v48, 1  ;;  %v650_v53 = vrot.slane %v649_v49, 2 }
 0x25e   : > { %v643_v54 = vrot.slane %v642_v50, 2  ;;  %v631_v55 = vrot.slane %v630_v51, 1 }
 0x25f   : > { %v651_v56 = vadd.f32 %v650_v53, %v649_v49  ;;  %v639_v57 = vadd.f32 %v638_v52, %v637_v48 }
 0x260   : > { %v644_v58 = vadd.f32 %v643_v54, %v642_v50  ;;  %v632_v59 = vadd.f32 %v631_v55, %v630_v51 }
 0x261   : > { %v652_v60 = vrot.slane %v651_v56, 1  ;;  %1472 = vrcp.f32 %v639_v57 }
 0x262   : > { %v645_v61 = vrot.slane %v644_v58, 1  ;;  %1474 = vrcp.f32 %v632_v59 }
 0x263   : > { %v653_v62 = vadd.f32 %v652_v60, %v651_v56 }
 0x264   : > { %v646_v63 = vadd.f32 %v645_v61, %v644_v58 }
 0x265   : > { %1476 = vrcp.f32 %v653_v62 }
 0x266   : > { %1478 = vrcp.f32 %v646_v63 }
 0x26b   : > { %v1473_v1 = vpop.eup %1472 }
 0x26c   : > { %v1475_v2 = vpop.eup %1474  ;;  %v659_v4 = vmul.f32 %v1473_v1, %v1465_v30  ;;  %v356_v30 = vsub.s32 1, %v1926_v15 }
 0x26d   : > { %v658_v3 = vmul.f32 %v1475_v2, %v1467_v31 }
 0x26e   : > { %v357_v31 = vrot.slane %v1936_v23, %v356_v30 }
 0x26f   : > { %v1477_v5 = vpop.eup %1476  ;;  %1211 = vmatprep.mubr.msk.f32.mxu0 %vm585_vm0, %v658_v3  ;;  %v1079_v3 = vld [vmem:[#allocation7] ss:$0 sm:$0xff] }
 0x270   : > { %v1479_v6 = vpop.eup %1478  ;;  %1212 = vmatmul.mubr.msk.f32.vlgmr.msra.gmra.mrb[0].mxu0 %vm585_vm0, %v659_v4  ;;  %v661_v8 = vmul.f32 %v1477_v5, %v1469_v37  ;;  %v429_v33 = vadd.f32 %v1939_v32, %v357_v31 }
 0x271   : > { %v660_v7 = vmul.f32 %v1479_v6, %v1471_v39 }
 0x273   : > { %1214 = vmatprep.mubr.msk.f32.mxu0 %vm585_vm0, %v660_v7 }
 0x274   : > { %1215 = vmatmul.mubr.msk.f32.gmra.mrb[2].mxu0 %vm585_vm0, %v661_v8 }
 0x343   : > { %v1213_v42 = vpop.f32.mrb[0].mxu0 }
 0x344   : > { %v808_v34 = vmul.f32 %v1213_v42, %v429_v33  ;;  %v788_v35 = vpop.f32.mrb[1].mxu0 }
 0x345   : > { %v807_v36 = vmul.f32 %v788_v35, %v429_v33 }
 0x346   : > { %v817_v37 = vrot.slane %v808_v34, 4 }
 0x347   : > { %v811_v38 = vrot.slane %v807_v36, 4  ;;  %v1216_v39 = vpop.f32.mrb[2].mxu0 }
 0x348   : > { %v818_v40 = vadd.f32 %v817_v37, %v808_v34  ;;  %v810_v41 = vmul.f32 %v1216_v39, %v429_v33  ;;  %v798_v43 = vpop.f32.mrb[3].mxu0 }
 0x349   : > { %v812_v44 = vadd.f32 %v811_v38, %v807_v36  ;;  %v809_v45 = vmul.f32 %v798_v43, %v429_v33 }
 0x34a   : > { %v819_v46 = vrot.slane %v818_v40, 2  ;;  %v829_v0 = vrot.slane %v810_v41, 4 }
 0x34b   : > { %v813_v47 = vrot.slane %v812_v44, 2  ;;  %v823_v15 = vrot.slane %v809_v45, 4 }
 0x34c   : > { %v820_v48 = vadd.f32 %v819_v46, %v818_v40  ;;  %v830_v23 = vadd.f32 %v829_v0, %v810_v41 }
 0x34d   : > { %v814_v49 = vadd.f32 %v813_v47, %v812_v44  ;;  %v824_v32 = vadd.f32 %v823_v15, %v809_v45 }
 0x34e   : > { %v821_v50 = vrot.slane %v820_v48, 1  ;;  %v831_v51 = vrot.slane %v830_v23, 2 }
 0x34f   : > { %v815_v52 = vrot.slane %v814_v49, 1  ;;  %v825_v53 = vrot.slane %v824_v32, 2 }
 0x350   : > { %v822_v54 = vadd.f32 %v821_v50, %v820_v48  ;;  %v832_v55 = vadd.f32 %v831_v51, %v830_v23 }
 0x351   : > { %v816_v56 = vadd.f32 %v815_v52, %v814_v49  ;;  %v826_v57 = vadd.f32 %v825_v53, %v824_v32 }
 0x352   : > { %v833_v58 = vrot.slane %v832_v55, 1 }
 0x353   : > { %v840_v59 = vsel %vm839_vm3, %v822_v54, %v816_v56  ;;  %v827_v60 = vrot.slane %v826_v57, 1 }
 0x354   : > { %v834_v62 = vadd.f32 %v833_v58, %v832_v55 }
 0x355   : > { %v828_v61 = vadd.f32 %v827_v60, %v826_v57 }
 0x357   : > { %v842_v63 = vsel %vm841_vm4, %v828_v61, %v840_v59 }
 0x358   : > { %v844_v1 = vsel %vm843_vm5, %v834_v62, %v842_v63 }
 0x359   : > { %v846_v2 = vadd.f32 %v844_v1, %v1929_v18 }
 0x35b   : > { %1250 = vmatmul.mubr.f32.vlgmr.msra.gmra.mrb[6].mxu1 %v846_v2 }
 0x42e   : > { %v936_v4 = vpop.f32.mrb[6].mxu1 }
 0x42f   : > { %v937_v5 = vadd.f32 %v1079_v3, %v936_v4  ;;  %v1251_v6 = vpop.f32.mrb[7].mxu1 }
 0x431   : > { %v940_v7 = vmax.f32 %v937_v5, 0.0 }
 0x433   : > { %v941_v8 = vadd.f32 %v940_v7, %v846_v2 }
 0x435   : > { %942 = vst [vmem:[%s309_s10] sm:$0xf] %v941_v8 }
 0x436   : > { %1577 = shalt.err (!%p1574_p9)
}
 0x437   : > { %s1578_s19 = scalar_lea.hbm %s2019_s29, 64  ;;  %s1582_s16 = scalar_lea.hbm %s2068_s7, 128 }
 0x438   : > { %p1579_p2 = scmp.ne.s32.totalorder %s2019_s29, %s1578_s19  ;;  %p1583_p4 = scmp.lt.u32.totalorder %s2019_s29, %s2068_s7 }
 0x439   : > { %p1584_p5 = scmp.lt.u32.totalorder %s1582_s16, %s1578_s19  ;;  %p1586_p12 = scmp.lt.u32.totalorder %s1578_s19, %s2019_s29 }
 0x43a   : > { %p1580_p3 = pnand %p1579_p2, %p2090_p7 }
 0x43b   : > { %p1585_p10 = por %p1584_p5, %p1583_p4 }
 0x43c   : > { %p1581_p0 = pneg %p1580_p3 }
 0x43d   : > { %p1587_p8 = por %p1586_p12, %p1585_p10 }
 0x43f   : > { %p1588_p11 = pnand %p1587_p8, %p1581_p0 }
 0x441   : > { %1591 = shalt.err (!%p1588_p11)
}
 0x442   : > { %1400 = dma.vmem_to_hbm [thread:$0]  (%p2090_p7), %s2021_s21, 64, %s2019_s29, %s944_s8  }
 0x443 PF: > { %p1422_p13 = scmp.ge.s32.totalorder %s1634_s27, 2  ;;  %s969_s26 = sand.u32 1, %s1622_s24  }
 0x444   : > { %p2091_p1 = scmp.ne.s32.totalorder %s2079_s12, 0  ;;  %s970_s30 = scalar_lea.sflag [#allocation4], %s969_s26 }
 0x446   : > { %p1413_p6 = pnand %p1422_p13, %p2091_p1 }
 0x448   : > { %1617 = dma.done.wait (!%p1413_p6), %s970_s30, 64  }
 0x449   : > { %1619 = vsyncadd (!%p1413_p6), %s970_s30, 4294967232  ;;  %s2092_s27 = sld [smem:[#allocation13_spill]]  ;;  %s2093_s10 = sld [smem:[#allocation12_spill]] }
 0x44a   : > { %s2094_s26 = sld [smem:[#allocation14_spill]]  ;;  %s2095_s24 = smov %s1626_s25 }
 0x44f   : > { %p19_p9 = scmp.ge.s32.totalorder %s2092_s27, 4   ;;  %s2096_s25 = smov %s2093_s10 }
 0x451   :  { %21 = sbr.rel (!%p19_p9) target bundleno = 5 (0x5), region = 96 }
 0x458   :  { %975 = vsyncpa [#allocation3], 1 }
 0x459   :  { %977 = vsyncpa [#allocation3 + $0x1], 1 }
 0x45a   :  { %978 = vsyncpa [#allocation6], 1 }
 0x45b   :  { %979 = vsyncpa [#allocation4], 1 }
 0x45c   :  { %981 = vsyncpa [#allocation4 + $0x1], 1 }

</bundles_post_ra>
